<compile_context>
chip_gen: v7x
topology: tpu7x:2x2x1
jax: 0.10.0
libtpu: 0.0.40
codegen_flags: <defaults>
</compile_context>

<pallas_src>
import jax
import jax.numpy as jnp
import numpy as np
from jax.experimental import pallas as pl
from jax.experimental.pallas import tpu as pltpu

_LANE = 128
_TARGET_BLOCK_BYTES = 6 * 1024 * 1024     # per x/out block (good for v6e/v7x, fine on v5e)
_VMEM_LIMIT_BYTES = 48 * 1024 * 1024      # < v7x's 64 MiB physical; >> worst-case usage


def _round_down(x: int, m: int) -> int:
    return (x // m) * m


def _sublane_pack(itemsize: int) -> int:
    # Rows per vreg sublane group: 8 for 4-byte, 16 for 2-byte, 32 for 1-byte dtypes.
    return max(8, 32 // itemsize)


def make_pos_enc(max_seq_len: int, embed_dim: int) -> jnp.ndarray:
    """Vectorized (numpy) equivalent of the torch __init__ double loop; fp32 table."""
    if embed_dim % 2 != 0:
        raise ValueError("embed_dim must be even (the torch reference assumes this).")
    pos = np.arange(max_seq_len, dtype=np.float64)[:, None]
    i = np.arange(0, embed_dim, 2, dtype=np.float64)[None, :]      # absolute even columns
    pe = np.zeros((max_seq_len, embed_dim), dtype=np.float64)
    # Matches the reference exactly, including its 2*(i+1)/embed_dim cos exponent.
    pe[:, 0::2] = np.sin(pos / 10000.0 ** (2.0 * i / embed_dim))
    pe[:, 1::2] = np.cos(pos / 10000.0 ** (2.0 * (i + 1.0) / embed_dim))
    return jnp.asarray(pe, dtype=jnp.float32)


def _add_pe_kernel(x_ref, pe_ref, o_ref):
    # pe stays fp32; promote x, add in fp32 (free on the VPU here), store in x's dtype.
    o_ref[...] = (x_ref[...].astype(jnp.float32) + pe_ref[...]).astype(o_ref.dtype)


def _pallas_add(x_arr, pe_arr, x_block, pe_block, grid_major, grid_batch,
                swap_axes, out_shape, donate_x):
    """Shared pallas_call builder. Major axis = flattened/sequence axis, batch axis = B."""
    nd = len(x_block)
    if swap_axes:
        # batch outer (ensures >=2 outer blocks for v7x's two TensorCores)
        grid = (grid_batch, grid_major)
        def x_map(b, m):
            return (b, m) if nd == 2 else (b, m, 0)
        def pe_map(b, m):
            return (0, m) if nd == 2 else (0, m, 0)
    else:
        # batch innermost: pe block index constant across it -> tile stays resident
        grid = (grid_major, grid_batch)
        def x_map(m, b):
            return (b, m) if nd == 2 else (b, m, 0)
        def pe_map(m, b):
            return (0, m) if nd == 2 else (0, m, 0)

    return pl.pallas_call(
        _add_pe_kernel,
        out_shape=out_shape,
        grid_spec=pltpu.PrefetchScalarGridSpec(
            num_scalar_prefetch=0,
            grid=grid,
            in_specs=[pl.BlockSpec(x_block, x_map),
                      pl.BlockSpec(pe_block, pe_map)],
            out_specs=pl.BlockSpec(x_block, x_map),
        ),
        compiler_params=pltpu.CompilerParams(
            dimension_semantics=("parallel", "parallel"),
            vmem_limit_bytes=_VMEM_LIMIT_BYTES,
        ),
        input_output_aliases=({0: 0} if donate_x else {}),
    )(x_arr, pe_arr)


def _forward_flat(x, pe32_full, donate_x):
    """Fast path: S*E is a multiple of 128 -> flatten (S,E) to a dense lane axis."""
    B, S, E = x.shape
    N = S * E
    itemsize = jnp.dtype(x.dtype).itemsize
    sub = _sublane_pack(itemsize)

    x2 = x.reshape(B, N)                       # bitcast reshape (free)
    pe2 = pe32_full.reshape(1, -1)             # (1, max_seq_len*E) fp32, no slice copy

    # Lane tile: multiple of 128 sized for ~_TARGET_BLOCK_BYTES per x block; the
    # denominator also bounds the fp32 pe block (4 B/lane element).
    tB0 = B if B <= sub else sub
    denom = max(tB0 * itemsize, 4)
    tN = min(N, max(_LANE, _round_down(_TARGET_BLOCK_BYTES // denom, _LANE)))

    # Sublane tile: grow past the pack factor once the lane tile saturates at N.
    rows_budget = max(1, _TARGET_BLOCK_BYTES // (tN * itemsize))
    if rows_budget >= B:
        tB = B
    elif rows_budget >= sub:
        tB = _round_down(rows_budget, sub)
    else:
        tB = tB0

    grid_n = pl.cdiv(N, tN)
    grid_b = pl.cdiv(B, tB)
    swap = (grid_n == 1 and grid_b > 1)

    out2 = _pallas_add(x2, pe2, (tB, tN), (1, tN), grid_n, grid_b, swap,
                       jax.ShapeDtypeStruct((B, N), x.dtype), donate_x)
    return out2.reshape(B, S, E)


def _forward_seq_tiled(x, pe32_full, donate_x):
    """Fallback for non-128-aligned S*E: keep E as the lane dim, tile along S."""
    B, S, E = x.shape
    itemsize = jnp.dtype(x.dtype).itemsize
    sub = _sublane_pack(itemsize)

    # Small one-time slice so pe and x share the same S extent (keeps tS = S a
    # legal full-extent block even when S is not a multiple of the pack factor).
    pe3 = pe32_full[:S, :].reshape(1, S, E)

    row_bytes = E * max(itemsize, 4)           # bounds both x and fp32 pe rows
    rows_budget = max(1, _TARGET_BLOCK_BYTES // row_bytes)
    if rows_budget >= S or S < sub:
        tS = S
        tB = max(1, min(B, _TARGET_BLOCK_BYTES // (S * E * itemsize)))
    else:
        tS = max(sub, _round_down(min(rows_budget, S), sub))
        tB = 1

    grid_s = pl.cdiv(S, tS)
    grid_b = pl.cdiv(B, tB)
    swap = (grid_s == 1 and grid_b > 1)

    return _pallas_add(x, pe3, (tB, tS, E), (1, tS, E), grid_s, grid_b, swap,
                       jax.ShapeDtypeStruct((B, S, E), x.dtype), donate_x)


def positional_encoding_forward(x: jnp.ndarray, pos_enc: jnp.ndarray,
                                *, donate_x: bool = False) -> jnp.ndarray:
    """x: (B, S, E); pos_enc: (max_seq_len, E) fp32 table. Returns x + pos_enc[:S]."""
    B, S, E = x.shape
    max_seq_len, e2 = pos_enc.shape
    if e2 != E:
        raise ValueError(f"embed_dim mismatch: x has {E}, pos_enc has {e2}")
    if S > max_seq_len:
        raise ValueError(f"sequence length {S} exceeds max_seq_len {max_seq_len}")

    pe32 = pos_enc.astype(jnp.float32)         # no-op when the table is already fp32
    if (S * E) % _LANE == 0:
        return _forward_flat(x, pe32, donate_x)
    return _forward_seq_tiled(x, pe32, donate_x)


if __name__ == "__main__":
    max_seq_len = 16
    embed_dim = 32
    B, S = 2, 8

    pos_enc = make_pos_enc(max_seq_len, embed_dim)

    key = jax.random.PRNGKey(0)
    x = jax.random.normal(key, (B, S, embed_dim), dtype=jnp.float32)

    out = positional_encoding_forward(x, pos_enc)
    jax.block_until_ready(out)

    ref = x + pos_enc[None, :S, :]
    assert out.shape == (B, S, embed_dim)
    assert jnp.allclose(out, ref, atol=1e-6), "mismatch vs reference (flat path)"

    # Also exercise the non-128-aligned (sequence-tiled) fallback path.
    E2, B2, S2 = 12, 3, 5                      # S2*E2 = 60, not a multiple of 128
    pos_enc2 = make_pos_enc(max_seq_len, E2)
    x2 = jax.random.normal(jax.random.PRNGKey(1), (B2, S2, E2), dtype=jnp.float32)
    out2 = positional_encoding_forward(x2, pos_enc2)
    jax.block_until_ready(out2)
    ref2 = x2 + pos_enc2[None, :S2, :]
    assert jnp.allclose(out2, ref2, atol=1e-6), "mismatch vs reference (seq-tiled path)"

    print("KERNEL_OK")
</pallas_src>

<mosaic_0001>
module attributes {stable_mosaic.version = 11 : i64} {
  func.func @_add_pe_kernel(%arg0: i32, %arg1: i32, %arg2: memref<2x256xf32, #tpu.memory_space<vmem>>, %arg3: memref<1x256xf32, #tpu.memory_space<vmem>>, %arg4: memref<2x256xf32, #tpu.memory_space<vmem>>) attributes {dimension_semantics = [#tpu.dimension_semantics<parallel>, #tpu.dimension_semantics<parallel>], iteration_bounds = array<i64: 1, 1>, scalar_prefetch = 0 : i64, scratch_operands = 0 : i64, tpu.core_type = #tpu.core_type<tc>, window_params = [{transform_indices = @transform_0, window_bounds = array<i64: 2, 256>}, {transform_indices = @transform_1, window_bounds = array<i64: 1, 256>}, {transform_indices = @transform_2, window_bounds = array<i64: 2, 256>}]} {
    %c0 = arith.constant 0 : index
    %c0_0 = arith.constant 0 : index
    %0 = vector.load %arg2[%c0, %c0_0] : memref<2x256xf32, #tpu.memory_space<vmem>>, vector<2x256xf32>
    %c0_1 = arith.constant 0 : index
    %c0_2 = arith.constant 0 : index
    %1 = vector.load %arg3[%c0_1, %c0_2] : memref<1x256xf32, #tpu.memory_space<vmem>>, vector<1x256xf32>
    %2 = vector.broadcast %1 : vector<1x256xf32> to vector<2x256xf32>
    %3 = arith.addf %0, %2 : vector<2x256xf32>
    %c0_3 = arith.constant 0 : index
    %c0_4 = arith.constant 0 : index
    %4 = vector.load %arg4[%c0_3, %c0_4] : memref<2x256xf32, #tpu.memory_space<vmem>>, vector<2x256xf32>
    tpu.vector_store %arg4[%c0_3, %c0_4], %3 {strides = array<i32>} : memref<2x256xf32, #tpu.memory_space<vmem>>, vector<2x256xf32>,
    return
  }
  func.func @transform_0(%arg0: i32, %arg1: i32) -> (i32, i32) {
    %c0_i32 = arith.constant 0 : i32
    return %arg1, %arg0 : i32, i32
  }
  func.func @transform_1(%arg0: i32, %arg1: i32) -> (i32, i32) {
    %c0_i32 = arith.constant 0 : i32
    %c0_i32_0 = arith.constant 0 : i32
    return %c0_i32, %arg0 : i32, i32
  }
  func.func @transform_2(%arg0: i32, %arg1: i32) -> (i32, i32) {
    %c0_i32 = arith.constant 0 : i32
    return %arg1, %arg0 : i32, i32
  }
}

</mosaic_0001>

<bundles_post_ra>
// kernel: tpu_custom_call.1
= control target key start
LH: loop header
LB: loop body
LE: loop exit
PB: predicated region body
PF: predicated region fallthrough
CT: control target
= control target key end

     0   :  { %7 = vsyncpa [#allocation3], 0  ;;  %s215_s0 = inlined_call_operand.hbm [shape: f32[2,256], index: 0, kind: input, shape index: {}]   ;;  %s216_s1 = inlined_call_operand.hbm [shape: f32[1,512], index: 1, kind: input, shape index: {}]   ;;  %s217_s2 = inlined_call_operand.hbm [shape: f32[2,256], index: 2, kind: output, shape index: {}]  }
   0x1   :  { %8 = vsyncpa [#allocation6], 0 }
   0x2   :  { %9 = vsyncpa [#allocation4], 0  ;;  %s150_s9 = smov [#allocation2]   ;;  %s151_s11 = smov [#allocation5]  }
   0x3   :  { %s16_s10 = sshll.u32 %s150_s9, 4  ;;  %s26_s12 = sshll.u32 %s151_s11, 4  ;;  %s17_s10 = int_to_ptr.vmem [resolvable:$true] %s16_s10  ;;  %s169_s12 = int_to_ptr.vmem [resolvable:$true] %s26_s12 }
   0x4   :  { %s78_s15 = scalar_lea.hbm %s215_s0, 64 }
   0x5   :  { %p79_p0 = scmp.ne.s32.totalorder %s215_s0, %s78_s15  ;;  %p82_p1 = scmp.lt.u32.totalorder %s78_s15, %s215_s0 }
   0x7   :  { %p84_p2 = pnand %p82_p1, %p79_p0 }
   0x9   :  { %87 = shalt.err (!%p84_p2)
}
   0xa   :  { %s88_s20 = scalar_lea.vmem %s17_s10, 64  ;;  %p93_p4 = scmp.lt.s32.totalorder %s17_s10, %s17_s10 }
   0xb   :  { %p89_p3 = scmp.ne.s32.totalorder %s17_s10, %s88_s20  ;;  %p94_p5 = scmp.lt.s32.totalorder %s88_s20, %s88_s20 }
   0xd   :  { %p95_p6 = por %p94_p5, %p93_p4 }
   0xf   :  { %p96_p7 = pnand %p95_p6, %p89_p3 }
  0x11   :  { %99 = shalt.err (!%p96_p7)
}
  0x12   :  { %19 = dma.hbm_to_vmem [thread:$0]  %s215_s0, 64, %s17_s10, [#allocation3]  }
  0x13   :  { %s100_s25 = scalar_lea.hbm %s216_s1, 32  ;;  %s102_s30 = scalar_lea.hbm %s216_s1, 64 }
  0x14   :  { %p101_p8 = scmp.ne.s32.totalorder %s216_s1, %s100_s25  ;;  %p103_p9 = scmp.lt.u32.totalorder %s102_s30, %s100_s25 }
  0x15   :  { %p104_p10 = scmp.lt.u32.totalorder %s100_s25, %s216_s1 }
  0x17   :  { %p105_p11 = por %p104_p10, %p103_p9 }
  0x19   :  { %p106_p12 = pnand %p105_p11, %p101_p8 }
  0x1b   :  { %109 = shalt.err (!%p106_p12)
}
  0x1c   :  { %s110_s0 = scalar_lea.vmem %s169_s12, 32  ;;  %p115_p0 = scmp.lt.s32.totalorder %s169_s12, %s169_s12 }
  0x1d   :  { %p111_p13 = scmp.ne.s32.totalorder %s169_s12, %s110_s0  ;;  %p116_p1 = scmp.lt.s32.totalorder %s110_s0, %s110_s0 }
  0x1f   :  { %p117_p2 = por %p116_p1, %p115_p0 }
  0x21   :  { %p118_p3 = pnand %p117_p2, %p111_p13 }
  0x23   :  { %121 = shalt.err (!%p118_p3)
}
  0x24   :  { %29 = dma.hbm_to_vmem [thread:$0]  %s216_s1, 32, %s169_s12, [#allocation6]  }
  0x25   :  { %144 = dma.done.wait [#allocation3], 64  }
  0x26   :  { %145 = vsyncadd [#allocation3], 4294967232 }
  0x27   :  { %146 = dma.done.wait [#allocation6], 32  }
  0x28   :  { %147 = vsyncadd [#allocation6], 4294967264  ;;  %v39_v0 = vlaneseq  ;;  %v152_v1 = vmov 1983009808   ;;  %v37_v7 = vld [vmem:[#allocation5] sm:$0x3] }
  0x29   :  { %v49_v2 = vunpack.c.l.s4 %v152_v1  ;;  %v36_v12 = vld [vmem:[#allocation2] sm:$0xf]  ;;  %s153_s7 = smov [#allocation7]  }
  0x2a   :  { %v40_v3 = vshrl.u32 %v39_v0, 7  ;;  %s64_s8 = sshll.u32 %s153_s7, 4  ;;  %s65_s8 = int_to_ptr.vmem [resolvable:$true] %s64_s8 }
  0x2b   :  { %v50_v6 = vunpack.c.0.s8 %v49_v2  ;;  %s122_s1 = scalar_lea.vmem %s65_s8, 64  ;;  %p127_p5 = scmp.lt.s32.totalorder %s65_s8, %s65_s8 }
  0x2c   :  { %v41_v4 = vsub.s32 0, %v40_v3  ;;  %v45_v5 = vsub.s32 1, %v40_v3  ;;  %p123_p4 = scmp.ne.s32.totalorder %s65_s8, %s122_s1  ;;  %p128_p6 = scmp.lt.s32.totalorder %s122_s1, %s122_s1 }
  0x2d   :  { %v53_v10 = vsub.s32 %v50_v6, %v40_v3 }
  0x2e   :  { %v42_v8 = vrot.slane %v37_v7, %v41_v4  ;;  %v46_v9 = vrot.slane %v37_v7, %v45_v5  ;;  %p129_p7 = por %p128_p6, %p127_p5 }
  0x30   :  { %v47_v11 = vcombine.low %v42_v8, %v46_v9  ;;  %p130_p8 = pnand %p129_p7, %p123_p4 }
  0x32   :  { %v54_v13 = vrot.slane %v47_v11, %v53_v10 }
  0x34   :  { %v56_v14 = vadd.f32 %v54_v13, %v36_v12 }
  0x36   :  { %57 = vst [vmem:[#allocation7] sm:$0xf] %v56_v14 }
  0x37   :  { %133 = shalt.err (!%p130_p8)
}
  0x38   :  { %s134_s11 = scalar_lea.hbm %s217_s2, 64 }
  0x39   :  { %p135_p9 = scmp.ne.s32.totalorder %s217_s2, %s134_s11  ;;  %p138_p10 = scmp.lt.u32.totalorder %s134_s11, %s217_s2 }
  0x3b   :  { %p140_p11 = pnand %p138_p10, %p135_p9 }
  0x3d   :  { %143 = shalt.err (!%p140_p11)
}
  0x3e   :  { %67 = dma.vmem_to_hbm [thread:$0]  %s65_s8, 64, %s217_s2, [#allocation4]  }
  0x3f   :  { %148 = dma.done.wait [#allocation4], 64  }
  0x40   :  { %149 = vsyncadd [#allocation4], 4294967232 }
  0x41   :  { %71 = vsyncpa [#allocation3], 1 }
  0x42   :  { %72 = vsyncpa [#allocation6], 1 }
  0x43   :  { %73 = vsyncpa [#allocation4], 1 }

</bundles_post_ra>
